<compile_context>
chip_gen: v5e
topology: v5e:2x2
jax: 0.10.0
libtpu: 0.0.40
codegen_flags: <defaults>
</compile_context>

<pallas_src>
import jax
import jax.numpy as jnp
from jax.experimental import pallas as pl
from jax.experimental.pallas import tpu as pltpu


def _mlp_kernel(xt_ref, w1t_ref, b1t_ref, w23t_ref, b23t_ref, o_ref):
    # ---- dense1 + ReLU:  h1^T = W1^T @ x^T  -> (128, TB), f32 accumulate ----
    h1 = jnp.dot(w1t_ref[...], xt_ref[...], preferred_element_type=jnp.float32)
    h1 = jnp.maximum(h1 + b1t_ref[...], 0.0)

    # ---- dense3 -> dropout(eval: identity) -> dense4, folded:
    #      logits^T = W23^T @ h1^T + b23^T  -> (3, TB)
    logits = jnp.dot(w23t_ref[...], h1.astype(w23t_ref.dtype),
                     preferred_element_type=jnp.float32) + b23t_ref[...]

    # ---- softmax over classes (sublane axis 0; lane-dense over TB), f32 ----
    m = jnp.max(logits, axis=0, keepdims=True)
    e = jnp.exp(logits - m)
    # Exact reciprocal (approx=False) so rows sum to 1 to f32 precision.
    inv = pl.reciprocal(jnp.sum(e, axis=0, keepdims=True), approx=False)
    o_ref[...] = (e * inv).astype(o_ref.dtype)


def _round_up(n, m):
    return ((n + m - 1) // m) * m


def mlp_forward(x, params, *, training=False, block_b=4096):
    """Eval-mode forward pass of the MLP. x: (B, 20) float32 -> (B, 3) float32."""
    if training:
        # The W2@W3 fold below is only valid while dropout is identity (eval).
        raise NotImplementedError("training-mode dropout is not implemented")

    w1, b1, w2, b2, w3, b3 = params
    B = x.shape[0]

    # Eval-mode fold of dense3/dense4 (dropout = identity at inference), in f32.
    w23 = jnp.dot(w2, w3)          # (128, 3)
    b23 = jnp.dot(b2, w3) + b3     # (1, 3)

    # Batch tile on the lane axis: multiple of 256 (MXU N width on v6e/v7x),
    # capped at ~ceil(B/2) so larger batches give >= 2 blocks (v7x megacore).
    LANE = 256
    tb = max(LANE, min(block_b, _round_up((B + 1) // 2, LANE)))
    n_blocks = pl.cdiv(B, tb)
    b_pad = n_blocks * tb

    # Transposed (batch-on-lanes) operands.  Transpose + bf16 cast + lane pad
    # of x fuse into one wrapper pass; padded columns are zeros (finite rows,
    # sliced off below).
    x_t = jnp.pad(x.T.astype(jnp.bfloat16), ((0, 0), (0, b_pad - B)))  # (20, b_pad)
    w1_t = w1.T.astype(jnp.bfloat16)      # (128, 20)
    b1_t = b1.T                           # (128, 1) f32
    w23_t = w23.T.astype(jnp.bfloat16)    # (3, 128)
    b23_t = b23.T                         # (3, 1)  f32

    flops = 2 * b_pad * (20 * 128 + 128 * 3)
    bytes_accessed = (
        b_pad * 20 * 2 + b_pad * 3 * 4              # x^T in (bf16) + out (f32)
        + w1_t.size * 2 + b1_t.size * 4             # weights/biases (DMA'd once)
        + w23_t.size * 2 + b23_t.size * 4
    )

    out_t = pl.pallas_call(
        _mlp_kernel,
        out_shape=jax.ShapeDtypeStruct((3, b_pad), jnp.float32),
        grid=(n_blocks,),
        in_specs=[
            pl.BlockSpec((20, tb), lambda i: (0, i)),    # x^T: streamed batch tile
            pl.BlockSpec((128, 20), lambda i: (0, 0)),   # W1^T: VMEM-resident
            pl.BlockSpec((128, 1), lambda i: (0, 0)),    # b1^T
            pl.BlockSpec((3, 128), lambda i: (0, 0)),    # W23^T (= (W2 @ W3)^T)
            pl.BlockSpec((3, 1), lambda i: (0, 0)),      # b23^T
        ],
        out_specs=pl.BlockSpec((3, tb), lambda i: (0, i)),
        compiler_params=pltpu.CompilerParams(
            dimension_semantics=("parallel",),
            vmem_limit_bytes=32 * 1024 * 1024,
        ),
        cost_estimate=pl.CostEstimate(
            flops=flops,
            transcendentals=3 * b_pad,
            bytes_accessed=bytes_accessed,
        ),
    )(x_t, w1_t, b1_t, w23_t, b23_t)

    # Back to the PyTorch-style (B, 3) class-minor output (tiny wrapper pass).
    return out_t[:, :B].T


def init_params(key):
    # Deterministic init mirroring PyTorch Linear's U(-1/sqrt(fan_in), 1/sqrt(fan_in)).
    # Weights stored as (in_features, out_features) == PyTorch weight.T.
    def linear(key, fan_in, fan_out):
        kw, kb = jax.random.split(key)
        bound = 1.0 / jnp.sqrt(fan_in)
        w = jax.random.uniform(kw, (fan_in, fan_out), jnp.float32, -bound, bound)
        b = jax.random.uniform(kb, (1, fan_out), jnp.float32, -bound, bound)
        return w, b

    k1, k2, k3 = jax.random.split(key, 3)
    w1, b1 = linear(k1, 20, 128)
    w2, b2 = linear(k2, 128, 64)
    w3, b3 = linear(k3, 64, 3)
    return (w1, b1, w2, b2, w3, b3)


if __name__ == "__main__":
    key = jax.random.PRNGKey(0)
    kx, kp = jax.random.split(key)

    B = 8  # small demo batch
    x = jax.random.normal(kx, (B, 20), dtype=jnp.float32)
    params = init_params(kp)

    out = jax.block_until_ready(mlp_forward(x, params))

    # Pure-JAX f32 reference (eval-mode dropout = identity).
    w1, b1, w2, b2, w3, b3 = params
    h = jnp.maximum(x @ w1 + b1, 0.0)
    h = h @ w2 + b2
    logits = h @ w3 + b3
    ref = jax.nn.softmax(logits, axis=-1)

    assert out.shape == (B, 3)
    assert jnp.allclose(jnp.sum(out, axis=-1), 1.0, atol=1e-3)   # exact-ish rows
    assert jnp.allclose(out, ref, atol=2e-2)                     # bf16-operand tolerance
    print("KERNEL_OK")
</pallas_src>

<mosaic_0001>
module attributes {stable_mosaic.version = 11 : i64} {
  func.func @_mlp_kernel(%arg0: i32, %arg1: memref<20x256xbf16, #tpu.memory_space<vmem>>, %arg2: memref<128x20xbf16, #tpu.memory_space<vmem>>, %arg3: memref<128x1xf32, #tpu.memory_space<vmem>>, %arg4: memref<3x128xbf16, #tpu.memory_space<vmem>>, %arg5: memref<3x1xf32, #tpu.memory_space<vmem>>, %arg6: memref<3x256xf32, #tpu.memory_space<vmem>>) attributes {dimension_semantics = [#tpu.dimension_semantics<parallel>], iteration_bounds = array<i64: 1>, scalar_prefetch = 0 : i64, scratch_operands = 0 : i64, tpu.core_type = #tpu.core_type<tc>, window_params = [{transform_indices = @transform_0, window_bounds = array<i64: 20, 256>}, {pipeline_mode = #tpu.pipeline_mode<synchronous>, transform_indices = @transform_1, window_bounds = array<i64: 128, 20>}, {pipeline_mode = #tpu.pipeline_mode<synchronous>, transform_indices = @transform_2, window_bounds = array<i64: 128, 1>}, {pipeline_mode = #tpu.pipeline_mode<synchronous>, transform_indices = @transform_3, window_bounds = array<i64: 3, 128>}, {pipeline_mode = #tpu.pipeline_mode<synchronous>, transform_indices = @transform_4, window_bounds = array<i64: 3, 1>}, {transform_indices = @transform_5, window_bounds = array<i64: 3, 256>}]} {
    %c0 = arith.constant 0 : index
    %c0_0 = arith.constant 0 : index
    %0 = vector.load %arg2[%c0, %c0_0] : memref<128x20xbf16, #tpu.memory_space<vmem>>, vector<128x20xbf16>
    %c0_1 = arith.constant 0 : index
    %c0_2 = arith.constant 0 : index
    %1 = vector.load %arg1[%c0_1, %c0_2] : memref<20x256xbf16, #tpu.memory_space<vmem>>, vector<20x256xbf16>
    %cst = arith.constant dense<0.000000e+00> : vector<128x256xf32>
    %2 = tpu.matmul %0, %1, %cst {dimension_numbers = #tpu.dot_dimension_numbers<[1], [0], [0], [1], [0, 0, 1, 1], [], []>} : vector<128x20xbf16>, vector<20x256xbf16>, vector<128x256xf32> -> vector<128x256xf32>
    %c0_3 = arith.constant 0 : index
    %c0_4 = arith.constant 0 : index
    %3 = vector.load %arg3[%c0_3, %c0_4] : memref<128x1xf32, #tpu.memory_space<vmem>>, vector<128x1xf32>
    %4 = vector.broadcast %3 : vector<128x1xf32> to vector<128x256xf32>
    %5 = arith.addf %2, %4 : vector<128x256xf32>
    %cst_5 = arith.constant 0.000000e+00 : f32
    %6 = vector.broadcast %cst_5 : f32 to vector<128x256xf32>
    %7 = arith.maximumf %5, %6 : vector<128x256xf32>
    %c0_6 = arith.constant 0 : index
    %c0_7 = arith.constant 0 : index
    %8 = vector.load %arg4[%c0_6, %c0_7] : memref<3x128xbf16, #tpu.memory_space<vmem>>, vector<3x128xbf16>
    %9 = arith.truncf %7 : vector<128x256xf32> to vector<128x256xbf16>
    %cst_8 = arith.constant dense<0.000000e+00> : vector<3x256xf32>
    %10 = tpu.matmul %8, %9, %cst_8 {dimension_numbers = #tpu.dot_dimension_numbers<[1], [0], [0], [1], [0, 0, 1, 1], [], []>} : vector<3x128xbf16>, vector<128x256xbf16>, vector<3x256xf32> -> vector<3x256xf32>
    %c0_9 = arith.constant 0 : index
    %c0_10 = arith.constant 0 : index
    %11 = vector.load %arg5[%c0_9, %c0_10] : memref<3x1xf32, #tpu.memory_space<vmem>>, vector<3x1xf32>
    %12 = vector.broadcast %11 : vector<3x1xf32> to vector<3x256xf32>
    %13 = arith.addf %10, %12 : vector<3x256xf32>
    %cst_11 = arith.constant dense<0xFF800000> : vector<256xf32>
    %14 = vector.multi_reduction <maximumf>, %13, %cst_11 [0] : vector<3x256xf32> to vector<256xf32>
    %15 = vector.shape_cast %14 : vector<256xf32> to vector<1x256xf32>
    %16 = vector.broadcast %15 : vector<1x256xf32> to vector<3x256xf32>
    %17 = arith.subf %13, %16 : vector<3x256xf32>
    %18 = math.exp %17 : vector<3x256xf32>
    %cst_12 = arith.constant dense<0.000000e+00> : vector<256xf32>
    %19 = vector.multi_reduction <add>, %18, %cst_12 [0] : vector<3x256xf32> to vector<256xf32>
    %20 = vector.shape_cast %19 : vector<256xf32> to vector<1x256xf32>
    %21 = tpu.reciprocal %20 : vector<1x256xf32> -> vector<1x256xf32>
    %22 = vector.broadcast %21 : vector<1x256xf32> to vector<3x256xf32>
    %23 = arith.mulf %18, %22 : vector<3x256xf32>
    %c0_13 = arith.constant 0 : index
    %c0_14 = arith.constant 0 : index
    %24 = vector.load %arg6[%c0_13, %c0_14] : memref<3x256xf32, #tpu.memory_space<vmem>>, vector<3x256xf32>
    tpu.vector_store %arg6[%c0_13, %c0_14], %23 {strides = array<i32>} : memref<3x256xf32, #tpu.memory_space<vmem>>, vector<3x256xf32>,
    return
  }
  func.func @transform_0(%arg0: i32) -> (i32, i32) {
    %c0_i32 = arith.constant 0 : i32
    %c0_i32_0 = arith.constant 0 : i32
    return %c0_i32, %arg0 : i32, i32
  }
  func.func @transform_1(%arg0: i32) -> (i32, i32) {
    %c0_i32 = arith.constant 0 : i32
    %c0_i32_0 = arith.constant 0 : i32
    %c0_i32_1 = arith.constant 0 : i32
    return %c0_i32, %c0_i32_0 : i32, i32
  }
  func.func @transform_2(%arg0: i32) -> (i32, i32) {
    %c0_i32 = arith.constant 0 : i32
    %c0_i32_0 = arith.constant 0 : i32
    %c0_i32_1 = arith.constant 0 : i32
    return %c0_i32, %c0_i32_0 : i32, i32
  }
  func.func @transform_3(%arg0: i32) -> (i32, i32) {
    %c0_i32 = arith.constant 0 : i32
    %c0_i32_0 = arith.constant 0 : i32
    %c0_i32_1 = arith.constant 0 : i32
    return %c0_i32, %c0_i32_0 : i32, i32
  }
  func.func @transform_4(%arg0: i32) -> (i32, i32) {
    %c0_i32 = arith.constant 0 : i32
    %c0_i32_0 = arith.constant 0 : i32
    %c0_i32_1 = arith.constant 0 : i32
    return %c0_i32, %c0_i32_0 : i32, i32
  }
  func.func @transform_5(%arg0: i32) -> (i32, i32) {
    %c0_i32 = arith.constant 0 : i32
    %c0_i32_0 = arith.constant 0 : i32
    return %c0_i32, %arg0 : i32, i32
  }
}

</mosaic_0001>

<bundles_post_ra>
// kernel: tpu_custom_call.1
= control target key start
LH: loop header
LB: loop body
LE: loop exit
PB: predicated region body
PF: predicated region fallthrough
CT: control target
= control target key end

     0   :  { %v600_v2 = vmov 0   ;;  %vm217_vm0 = vcmask 1041408   ;;  %s802_s0 = inlined_call_operand.vmem [shape: bf16[20,256], index: 0, kind: input, shape index: {}]   ;;  %s803_s1 = inlined_call_operand.vmem [shape: bf16[128,20], index: 1, kind: input, shape index: {}]   ;;  %s804_s2 = inlined_call_operand.vmem [shape: f32[128,1], index: 2, kind: input, shape index: {}]   ;;  %s805_s3 = inlined_call_operand.vmem [shape: bf16[3,128], index: 3, kind: input, shape index: {}]   ;;  %s806_s4 = inlined_call_operand.vmem [shape: f32[3,1], index: 4, kind: input, shape index: {}]   ;;  %s807_s5 = inlined_call_operand.hbm [shape: f32[3,256], index: 5, kind: output, shape index: {}]  }
   0x1   :  { %v55_v0 = vld [vmem:[%s804_s2 + $0x70] sm:$0xff]  ;;  %563 = vset.pattern.permute.xlu0 %v600_v2  ;;  %565 = vset.pattern.permute.xlu2 %v600_v2  ;;  %v525_v5 = vld [vmem:[%s802_s0] sm:$0xf]  ;;  %v556_v8 = vld [vmem:[%s802_s0 + $0x4] sm:$0xf0] }
   0x2   :  { %v40_v1 = vld [vmem:[%s802_s0 + $0x10] sm:$0x33]  ;;  %129 = vperm.xlu0 %563, %v55_v0   ;;  %564 = vset.pattern.permute.xlu1 %v600_v2  ;;  %v53_v9 = vld [vmem:[%s804_s2 + $0x60] sm:$0xff]  ;;  %v527_v12 = vld [vmem:[%s802_s0 + $0x8] sm:$0xf0]  ;;  %v526_v15 = vor.u32 %v556_v8, %v525_v5 }
   0x3   :  { %v184_v3 = vunpack.c.l.b16 %v40_v1  ;;  %v185_v4 = vunpack.c.h.b16 %v40_v1  ;;  %v51_v10 = vld [vmem:[%s804_s2 + $0x50] sm:$0xff]  ;;  %v555_v11 = vld [vmem:[%s802_s0 + $0x4] sm:$0xf]  ;;  %119 = vperm.xlu1 %564, %v53_v9   ;;  %v56_v16 = vld [vmem:[%s804_s2 + $0x78] sm:$0xff] }
   0x4   :  { %109 = vperm.xlu2 %565, %v51_v10   ;;  %v530_v17 = vor.u32 %v555_v11, %v527_v12 }
   0x5   :  { %v188_v6 = vpack.c.b16 %v184_v3, %v184_v3  ;;  %v189_v7 = vpack.c.b16 %v185_v4, %v185_v4 }
   0x7   :  { %v219_v13 = vsel %vm217_vm0, %v188_v6, 0  ;;  %v222_v14 = vsel %vm217_vm0, %v189_v7, 0 }
   0x8   :  { %230 = vmatpush.bf16.msra.mxu0 %v219_v13  ;;  %557 = vmatpush.bf16.msra.mxu2 %v219_v13 }
   0x9   :  { %279 = vmatpush.bf16.msra.mxu1 %v222_v14  ;;  %559 = vmatpush.bf16.msra.mxu3 %v222_v14 }
   0xa   :  { %10 = vsyncpa [#allocation3], 0  ;;  %v547_v18 = vld [vmem:[%s803_s1] sm:$0xff]  ;;  %v54_v19 = vld [vmem:[%s804_s2 + $0x68] sm:$0xff]  ;;  %134 = vperm.xlu0 %563, %v56_v16   ;;  %vm192_vm1 = vcmask 162816   ;;  %vm403_vm2 = vcmask 1042432  }
   0xb   :  { %v552_v20 = vld [vmem:[%s803_s1 + $0x28] sm:$0xff]  ;;  %v52_v21 = vld [vmem:[%s804_s2 + $0x58] sm:$0xff]  ;;  %124 = vperm.xlu1 %564, %v54_v19   ;;  %v49_v22 = vld [vmem:[%s804_s2 + $0x40] sm:$0xff]  ;;  %s482_s28 = sshll.u32 %s807_s5, 4  ;;  %vm471_vm11 = vcmask 1043456   ;;  %s483_s28 = int_to_ptr.hbm [resolvable:$true] %s482_s28 }
   0xc   :  { %231 = vmatpush.bf16.msra.mxu0 %v526_v15  ;;  %558 = vmatpush.bf16.msra.mxu2 %v526_v15  ;;  %v50_v23 = vld [vmem:[%s804_s2 + $0x48] sm:$0xff]  ;;  %v47_v24 = vld [vmem:[%s804_s2 + $0x30] sm:$0xff]  ;;  %v48_v25 = vld [vmem:[%s804_s2 + $0x38] sm:$0xff] }
   0xd   :  { %280 = vmatpush.bf16.msra.mxu1 %v530_v17  ;;  %560 = vmatpush.bf16.msra.mxu3 %v530_v17  ;;  %v548_v26 = vld [vmem:[%s803_s1 + $0x8] sm:$0xff]  ;;  %v45_v27 = vld [vmem:[%s804_s2 + $0x20] sm:$0xff]  ;;  %v553_v28 = vld [vmem:[%s803_s1 + $0x30] sm:$0xff] }
   0xe   :  { %114 = vperm.xlu2 %565, %v52_v21   ;;  %v46_v29 = vld [vmem:[%s804_s2 + $0x28] sm:$0xff]  ;;  %v43_v30 = vld [vmem:[%s804_s2 + $0x10] sm:$0xff]  ;;  %v44_v31 = vld [vmem:[%s804_s2 + $0x18] sm:$0xff] }
   0xf   :  { %531 = vmatmul.msk.bf16.vlgmr.msra.gmra.mxu0 %vm192_vm1, %v547_v18  ;;  %536 = vmatmul.msk.bf16.vlgmr.msra.gmra.mxu2 %vm192_vm1, %v552_v20  ;;  %v41_v32 = vld [vmem:[%s804_s2] sm:$0xff]  ;;  %v42_v33 = vld [vmem:[%s804_s2 + $0x8] sm:$0xff]  ;;  %v549_v34 = vld [vmem:[%s803_s1 + $0x10] sm:$0xff] }
  0x10   :  { %539 = vmatmul.msk.bf16.vlgmr.msra.gmra.mxu1 %vm192_vm1, %v547_v18  ;;  %544 = vmatmul.msk.bf16.vlgmr.msra.gmra.mxu3 %vm192_vm1, %v552_v20  ;;  %v371_v35 = vld [vmem:[%s806_s4] sm:$0x7]  ;;  %v554_v36 = vld [vmem:[%s803_s1 + $0x38] sm:$0xff] }
  0x11   :  { %v550_v37 = vld [vmem:[%s803_s1 + $0x18] sm:$0xff]  ;;  %v551_v38 = vld [vmem:[%s803_s1 + $0x20] sm:$0xff] }
  0x12   :  { %99 = vperm.xlu0 %563, %v49_v22  }
  0x13   :  { %104 = vperm.xlu1 %564, %v50_v23  }
  0x16   :  { %89 = vperm.xlu2 %565, %v47_v24  }
  0x1a   :  { %94 = vperm.xlu0 %563, %v48_v25  }
  0x1b   :  { %79 = vperm.xlu1 %564, %v45_v27  }
  0x1e   :  { %84 = vperm.xlu2 %565, %v46_v29  }
  0x1f   :  { %532 = vmatmul.msk.bf16.gmra.mxu0 %vm192_vm1, %v548_v26  ;;  %537 = vmatmul.msk.bf16.gmra.mxu2 %vm192_vm1, %v553_v28 }
  0x20   :  { %540 = vmatmul.msk.bf16.gmra.mxu1 %vm192_vm1, %v548_v26  ;;  %545 = vmatmul.msk.bf16.gmra.mxu3 %vm192_vm1, %v553_v28 }
  0x22   :  { %69 = vperm.xlu0 %563, %v43_v30  }
  0x23   :  { %74 = vperm.xlu1 %564, %v44_v31  }
  0x26   :  { %59 = vperm.xlu2 %565, %v41_v32  }
  0x2a   :  { %64 = vperm.xlu0 %563, %v42_v33  }
  0x2b   :  { %374 = vperm.xlu1 %564, %v371_v35  }
  0x2f   :  { %533 = vmatmul.msk.bf16.gmra.mxu0 %vm192_vm1, %v549_v34  ;;  %538 = vmatmul.msk.bf16.gmra.mxu2 %vm192_vm1, %v554_v36 }
  0x30   :  { %541 = vmatmul.msk.bf16.gmra.mxu1 %vm192_vm1, %v549_v34  ;;  %546 = vmatmul.msk.bf16.gmra.mxu3 %vm192_vm1, %v554_v36 }
  0x3f   :  { %534 = vmatmul.msk.bf16.gmra.mxu0 %vm192_vm1, %v550_v37 }
  0x40   :  { %542 = vmatmul.msk.bf16.gmra.mxu1 %vm192_vm1, %v550_v37 }
  0x4f   :  { %535 = vmatmul.msk.bf16.gmra.mxu0 %vm192_vm1, %v551_v38 }
  0x50   :  { %543 = vmatmul.msk.bf16.gmra.mxu1 %vm192_vm1, %v551_v38 }
  0x5e   :  { %v110_v39 = vpop.permute.xlu2 %109 }
  0x68   :  { %v738_v41 = vpop.permute.xlu2 %114 }
  0x70   :  { %v740_v43 = vpop.permute.xlu2 %89 }
  0x74   :  { %v130_v40 = vpop.permute.xlu0 %129 }
  0x75   :  { %v120_v14 = vpop.permute.xlu1 %119 }
  0x78   :  { %v746_v48 = vpop.permute.xlu2 %84 }
  0x7c   :  { %v135_v42 = vpop.permute.xlu0 %134 }
  0x7d   :  { %v125_v21 = vpop.permute.xlu1 %124 }
  0x80   :  { %v60_v54 = vpop.permute.xlu2 %59 }
  0x84   :  { %v742_v44 = vpop.permute.xlu0 %99 }
  0x8c   :  { %v233_v45 = vpop.f32.mrf.mxu0  ;;  %v744_v47 = vpop.permute.xlu0 %94 }
  0x8d   :  { %v282_v46 = vpop.f32.mrf.mxu1  ;;  %v234_v58 = vadd.f32 %v233_v45, %v60_v54 }
  0x8e   :  { %v283_v59 = vadd.f32 %v282_v46, %v60_v54 }
  0x8f   :  { %v322_v0 = vmax.f32 %v234_v58, 0.0 }
  0x90   :  { %v323_v1 = vmax.f32 %v283_v59, 0.0 }
  0x92   :  { %v258_v49 = vpop.f32.mrf.mxu2 }
  0x93   :  { %v307_v50 = vpop.f32.mrf.mxu3  ;;  %v259_v35 = vadd.f32 %v258_v49, %v110_v39 }
  0x94   :  { %v235_v51 = vpop.f32.mrf.mxu0  ;;  %v748_v53 = vpop.permute.xlu0 %69  ;;  %v308_v36 = vadd.f32 %v307_v50, %v110_v39 }
  0x95   :  { %v284_v52 = vpop.f32.mrf.mxu1  ;;  %v342_v59 = vmax.f32 %v259_v35, 0.0 }
  0x9a   :  { %v260_v55 = vpop.f32.mrf.mxu2 }
  0x9b   :  { %v309_v56 = vpop.f32.mrf.mxu3  ;;  %v261_v38 = vadd.f32 %v260_v55, %v738_v41 }
  0x9c   :  { %v750_v57 = vpop.f32.mrf.mxu0  ;;  %v65_v61 = vpop.permute.xlu0 %64 }
  0x9d   :  { %v752_v60 = vpop.f32.mrf.mxu1  ;;  %v236_v62 = vadd.f32 %v235_v51, %v65_v61  ;;  %v285_v63 = vadd.f32 %v284_v52, %v65_v61  ;;  %v310_v51 = vadd.f32 %v309_v56, %v738_v41  ;;  %v344_v61 = vmax.f32 %v261_v38, 0.0 }
  0x9f   :  { %v324_v2 = vmax.f32 %v236_v62, 0.0  ;;  %v325_v3 = vmax.f32 %v285_v63, 0.0  ;;  %v343_v63 = vmax.f32 %v308_v36, 0.0  ;;  %v345_v49 = vmax.f32 %v310_v51, 0.0 }
  0xa0   :  { %v365_v55 = vpack.c.bf16 %v344_v61, %v342_v59 }
  0xa1   :  { %v754_v5 = vpack.c.bf16 %v324_v2, %v322_v0  ;;  %v756_v6 = vpack.c.bf16 %v325_v3, %v323_v1  ;;  %v105_v0 = vpop.permute.xlu1 %104  ;;  %v366_v1 = vpack.c.bf16 %v345_v49, %v343_v63 }
  0xa2   :  { %v263_v4 = vpop.f32.mrf.mxu2 }
  0xa3   :  { %v312_v7 = vpop.f32.mrf.mxu3  ;;  %v264_v23 = vadd.f32 %v263_v4, %v120_v14 }
  0xa4   :  { %v758_v8 = vpop.f32.mrf.mxu0  ;;  %v313_v29 = vadd.f32 %v312_v7, %v120_v14 }
  0xa5   :  { %v760_v9 = vpop.f32.mrf.mxu1 }
  0xa6   :  { %v347_v52 = vmax.f32 %v313_v29, 0.0 }
  0xa9   :  { %v80_v2 = vpop.permute.xlu1 %79 }
  0xaa   :  { %v265_v10 = vpop.f32.mrf.mxu2 }
  0xab   :  { %v314_v11 = vpop.f32.mrf.mxu3  ;;  %v266_v24 = vadd.f32 %v265_v10, %v125_v21 }
  0xac   :  { %v762_v12 = vpop.f32.mrf.mxu0  ;;  %v315_v30 = vadd.f32 %v314_v11, %v125_v21 }
  0xad   :  { %v764_v13 = vpop.f32.mrf.mxu1  ;;  %v348_v45 = vmax.f32 %v266_v24, 0.0 }
  0xae   :  { %v349_v54 = vmax.f32 %v315_v30, 0.0 }
  0xb0   :  { %v368_v50 = vpack.c.bf16 %v349_v54, %v347_v52 }
  0xb2   :  { %v268_v15 = vpop.f32.mrf.mxu2 }
  0xb3   :  { %v317_v16 = vpop.f32.mrf.mxu3  ;;  %v269_v19 = vadd.f32 %v268_v15, %v130_v40 }
  0xb4   :  { %v766_v17 = vpop.f32.mrf.mxu0  ;;  %v318_v20 = vadd.f32 %v317_v16, %v130_v40  ;;  %v346_v40 = vmax.f32 %v264_v23, 0.0 }
  0xb5   :  { %v768_v18 = vpop.f32.mrf.mxu1  ;;  %v350_v25 = vmax.f32 %v269_v19, 0.0 }
  0xb6   :  { %v351_v31 = vmax.f32 %v318_v20, 0.0  ;;  %v367_v62 = vpack.c.bf16 %v348_v45, %v346_v40  ;;  %v295_v29 = vadd.f32 %v768_v18, %v746_v48 }
  0xb8   :  { %v333_v36 = vmax.f32 %v295_v29, 0.0 }
  0xba   :  { %v270_v22 = vpop.f32.mrf.mxu2 }
  0xbb   :  { %v271_v26 = vadd.f32 %v270_v22, %v135_v42  ;;  %v319_v27 = vpop.f32.mrf.mxu3 }
  0xbc   :  { %v248_v28 = vpop.f32.mrf.mxu0  ;;  %v320_v32 = vadd.f32 %v319_v27, %v135_v42  ;;  %v75_v27 = vpop.permute.xlu1 %74 }
  0xbd   :  { %v297_v33 = vpop.f32.mrf.mxu1  ;;  %v352_v34 = vmax.f32 %v271_v26, 0.0  ;;  %v249_v19 = vadd.f32 %v248_v28, %v740_v43  ;;  %v290_v35 = vadd.f32 %v760_v9, %v75_v27 }
  0xbe   :  { %v353_v37 = vmax.f32 %v320_v32, 0.0  ;;  %v298_v22 = vadd.f32 %v297_v33, %v740_v43  ;;  %v293_v32 = vadd.f32 %v764_v13, %v80_v2  ;;  %v241_v33 = vadd.f32 %v758_v8, %v75_v27 }
  0xbf   :  { %v369_v46 = vpack.c.bf16 %v352_v34, %v350_v25  ;;  %v246_v25 = vadd.f32 %v766_v17, %v746_v48  ;;  %v334_v28 = vmax.f32 %v249_v19, 0.0  ;;  %v239_v48 = vadd.f32 %v750_v57, %v748_v53 }
  0xc0   :  { %v370_v58 = vpack.c.bf16 %v353_v37, %v351_v31  ;;  %v244_v31 = vadd.f32 %v762_v12, %v80_v2  ;;  %v335_v43 = vmax.f32 %v298_v22, 0.0  ;;  %v288_v12 = vadd.f32 %v752_v60, %v748_v53  ;;  %v354_v53 = vld [vmem:[%s805_s3] sm:$0x3]  ;;  %s601_s3 = smov [#allocation2]  }
  0xc1   :  { %377 = vmatpush.bf16.msrb.mxu2 %v369_v46  ;;  %v332_v34 = vmax.f32 %v246_v25, 0.0  ;;  %v331_v38 = vmax.f32 %v293_v32, 0.0  ;;  %v328_v13 = vmax.f32 %v241_v33, 0.0  ;;  %v329_v45 = vmax.f32 %v290_v35, 0.0  ;;  %s480_s25 = sshll.u32 %s601_s3, 4  ;;  %s481_s25 = int_to_ptr.vmem [resolvable:$true] %s480_s25 }
  0xc2   :  { %390 = vmatpush.bf16.msrb.mxu3 %v370_v58  ;;  %v330_v18 = vmax.f32 %v244_v31, 0.0  ;;  %v326_v46 = vmax.f32 %v239_v48, 0.0  ;;  %v327_v51 = vmax.f32 %v288_v12, 0.0 }
  0xc3   :  { %v360_v8 = vpack.c.bf16 %v333_v36, %v331_v38 }
  0xc4   :  { %v250_v42 = vpop.f32.mrf.mxu0  ;;  %v359_v40 = vpack.c.bf16 %v332_v34, %v330_v18  ;;  %v357_v9 = vpack.c.bf16 %v328_v13, %v326_v46  ;;  %v358_v52 = vpack.c.bf16 %v329_v45, %v327_v51  ;;  %v375_v57 = vpop.permute.xlu1 %374 }
  0xc5   :  { %v299_v39 = vpop.f32.mrf.mxu1  ;;  %378 = vmatpush.bf16.msrb.mxu2 %v367_v62  ;;  %v251_v10 = vadd.f32 %v250_v42, %v744_v47 }
  0xc6   :  { %391 = vmatpush.bf16.msrb.mxu3 %v368_v50  ;;  %v300_v15 = vadd.f32 %v299_v39, %v744_v47 }
  0xc8   :  { %v337_v30 = vmax.f32 %v300_v15, 0.0 }
  0xc9   :  { %379 = vmatpush.bf16.msrb.mxu2 %v365_v55 }
  0xca   :  { %392 = vmatpush.bf16.msrb.mxu3 %v366_v1  ;;  %v362_v37 = vpack.c.bf16 %v337_v30, %v335_v43 }
  0xcc   :  { %v253_v41 = vpop.f32.mrf.mxu0 }
  0xcd   :  { %v302_v56 = vpop.f32.mrf.mxu1  ;;  %v254_v3 = vadd.f32 %v253_v41, %v742_v44 }
  0xce   :  { %v303_v4 = vadd.f32 %v302_v56, %v742_v44  ;;  %v336_v44 = vmax.f32 %v251_v10, 0.0 }
  0xcf   :  { %v338_v20 = vmax.f32 %v254_v3, 0.0 }
  0xd0   :  { %v339_v23 = vmax.f32 %v303_v4, 0.0  ;;  %v361_v17 = vpack.c.bf16 %v336_v44, %v334_v28 }
  0xd4   :  { %v255_v7 = vpop.f32.mrf.mxu0 }
  0xd5   :  { %v256_v11 = vadd.f32 %v255_v7, %v105_v0  ;;  %v304_v14 = vpop.f32.mrf.mxu1 }
  0xd6   :  { %v305_v16 = vadd.f32 %v304_v14, %v105_v0 }
  0xd7   :  { %v340_v21 = vmax.f32 %v256_v11, 0.0 }
  0xd8   :  { %v341_v24 = vmax.f32 %v305_v16, 0.0 }
  0xd9   :  { %v363_v26 = vpack.c.bf16 %v340_v21, %v338_v20 }
  0xda   :  { %v364_v47 = vpack.c.bf16 %v341_v24, %v339_v23 }
  0xdb   :  { %380 = vmatpush.bf16.msrb.mxu2 %v363_v26 }
  0xdc   :  { %393 = vmatpush.bf16.msrb.mxu3 %v364_v47 }
  0xdf   :  { %381 = vmatpush.bf16.msrb.mxu2 %v361_v17 }
  0xe0   :  { %394 = vmatpush.bf16.msrb.mxu3 %v362_v37 }
  0xe3   :  { %382 = vmatpush.bf16.msrb.mxu2 %v359_v40 }
  0xe4   :  { %395 = vmatpush.bf16.msrb.mxu3 %v360_v8 }
  0xe7   :  { %383 = vmatpush.bf16.msrb.mxu2 %v357_v9 }
  0xe8   :  { %396 = vmatpush.bf16.msrb.mxu3 %v358_v52 }
  0xeb   :  { %384 = vmatpush.bf16.msrb.mxu2 %v754_v5 }
  0xec   :  { %397 = vmatpush.bf16.msrb.mxu3 %v756_v6 }
  0xee   :  { %385 = vmatmul.bf16.vlgmr.msrb.gmra.mxu2 %v354_v53 }
  0xef   :  { %398 = vmatmul.bf16.vlgmr.msrb.gmra.mxu3 %v354_v53 }
 0x171   :  { %v386_v60 = vpop.f32.mrf.mxu2 }
 0x172   :  { %v387_v54 = vadd.f32 %v386_v60, %v375_v57  ;;  %v399_v58 = vpop.f32.mrf.mxu3 }
 0x173   :  { %v400_v59 = vadd.f32 %v399_v58, %v375_v57 }
 0x174   :  { %v404_v61 = vsel %vm403_vm2, %v387_v54, -inf }
 0x175   :  { %v405_v42 = vrot.slane %v404_v61, 4  ;;  %v411_v62 = vsel %vm403_vm2, %v400_v59, -inf }
 0x176   :  { %v412_v5 = vrot.slane %v411_v62, 4 }
 0x177   :  { %v406_v63 = vmax.f32 %v404_v61, %v405_v42 }
 0x178   :  { %v413_v49 = vmax.f32 %v411_v62, %v412_v5 }
 0x179   :  { %v407_v39 = vrot.slane %v406_v63, 2  ;;  %v388_v50 = vpop.f32.mrf.mxu2 }
 0x17a   :  { %v414_v0 = vrot.slane %v413_v49, 2  ;;  %v401_v6 = vpop.f32.mrf.mxu3 }
 0x17b   :  { %v408_v55 = vmax.f32 %v406_v63, %v407_v39 }
 0x17c   :  { %v415_v1 = vmax.f32 %v413_v49, %v414_v0 }
 0x17d   :  { %v409_v41 = vrot.slane %v408_v55, 1 }
 0x17e   :  { %v416_v56 = vrot.slane %v415_v1, 1 }
 0x17f   :  { %v410_v2 = vmax.f32 %v408_v55, %v409_v41 }
 0x180   :  { %v417_v3 = vmax.f32 %v415_v1, %v416_v56 }
 0x181   :  { %v418_v4 = vsub.f32 %v387_v54, %v410_v2 }
 0x182   :  { %v419_v7 = vsub.f32 %v400_v59, %v417_v3 }
 0x183   :  { %v420_v10 = vmul.f32 1.442695, %v418_v4 }
 0x184   :  { %v422_v11 = vmul.f32 1.442695, %v419_v7 }
 0x185   :  { %566 = vpow2.f32 %v420_v10 }
 0x186   :  { %568 = vpow2.f32 %v422_v11 }
 0x18b   :  { %v567_v14 = vpop.eup %566 }
 0x18c   :  { %v569_v15 = vpop.eup %568  ;;  %v424_v16 = vsel %vm403_vm2, %v567_v14, 0.0 }
 0x18d   :  { %v425_v19 = vrot.slane %v424_v16, 4  ;;  %v431_v20 = vsel %vm403_vm2, %v569_v15, 0.0 }
 0x18e   :  { %v432_v21 = vrot.slane %v431_v20, 4 }
 0x18f   :  { %v426_v22 = vadd.f32 %v425_v19, %v424_v16 }
 0x190   :  { %v433_v23 = vadd.f32 %v432_v21, %v431_v20 }
 0x191   :  { %v427_v24 = vrot.slane %v426_v22, 2 }
 0x192   :  { %v434_v25 = vrot.slane %v433_v23, 2 }
 0x193   :  { %v428_v44 = vadd.f32 %v427_v24, %v426_v22 }
 0x194   :  { %v435_v26 = vadd.f32 %v434_v25, %v433_v23 }
 0x195   :  { %v429_v27 = vrot.slane %v428_v44, 1 }
 0x196   :  { %v436_v29 = vrot.slane %v435_v26, 1 }
 0x197   :  { %v430_v30 = vadd.f32 %v429_v27, %v428_v44 }
 0x198   :  { %v437_v47 = vadd.f32 %v436_v29, %v435_v26 }
 0x199   :  { %570 = vrcp.f32 %v430_v30  ;;  %v449_v35 = vand.u32 2147483648, %v430_v30  ;;  %v447_v37 = vand.u32 2147483647, %v430_v30  ;;  %vm443_vm5 = vweird.f32 %v430_v30 }
 0x19a   :  { %572 = vrcp.f32 %v437_v47  ;;  %v463_v36 = vand.u32 2147483648, %v437_v47  ;;  %v461_v18 = vand.u32 2147483647, %v437_v47  ;;  %vm457_vm7 = vweird.f32 %v437_v47 }
 0x19b   :  { %v450_v40 = vor.u32 1.1754944e-38, %v449_v35  ;;  %vm448_vm9 = vcmp.eq.f32.partialorder %v447_v37, 8.507059e+37 }
 0x19c   :  { %v464_v45 = vor.u32 1.1754944e-38, %v463_v36  ;;  %vm462_vm10 = vcmp.eq.f32.partialorder %v461_v18, 8.507059e+37 }
 0x19f   :  { %v571_v31 = vpop.eup %570 }
 0x1a0   :  { %v573_v28 = vpop.eup %572  ;;  %v439_v32 = vmul.f32 %v571_v31, %v430_v30  ;;  %vm444_vm3 = vweird.f32 %v571_v31 }
 0x1a1   :  { %v453_v43 = vmul.f32 %v573_v28, %v437_v47  ;;  %vm458_vm4 = vweird.f32 %v573_v28  ;;  %vm445_vm6 = vmor %vm443_vm5, %vm444_vm3 }
 0x1a2   :  { %v440_v33 = vsub.f32 1.0, %v439_v32  ;;  %vm459_vm8 = vmor %vm457_vm7, %vm458_vm4 }
 0x1a3   :  { %v454_v34 = vsub.f32 1.0, %v453_v43 }
 0x1a4   :  { %v441_v17 = vmul.f32 %v571_v31, %v440_v33 }
 0x1a5   :  { %v455_v48 = vmul.f32 %v573_v28, %v454_v34 }
 0x1a6   :  { %v442_v12 = vadd.f32 %v571_v31, %v441_v17 }
 0x1a7   :  { %v456_v38 = vadd.f32 %v573_v28, %v455_v48 }
 0x1a8   :  { %v446_v13 = vsel %vm445_vm6, %v571_v31, %v442_v12 }
 0x1a9   :  { %v460_v8 = vsel %vm459_vm8, %v573_v28, %v456_v38  ;;  %v451_v46 = vsel %vm448_vm9, %v450_v40, %v446_v13 }
 0x1aa   :  { %v465_v51 = vsel %vm462_vm10, %v464_v45, %v460_v8  ;;  %v466_v52 = vmul.f32 %v567_v14, %v451_v46 }
 0x1ab   :  { %v467_v9 = vmul.f32 %v569_v15, %v465_v51 }
 0x1ad   :  { %v470_v53 = vrot.slane %v467_v9, 4 }
 0x1af   :  { %v472_v57 = vsel %vm471_vm11, %v466_v52, %v470_v53 }
 0x1b0   :  { %474 = vst [vmem:[#allocation2] sm:$0x77] %v472_v57 }
 0x1b1   :  { %485 = dma.vmem_to_hbm [thread:$0]  %s481_s25, 128, %s483_s28, [#allocation3]  }
 0x1b2   :  { %598 = dma.done.wait [#allocation3], 128  }
 0x1b3   :  { %599 = vsyncadd [#allocation3], 4294967168 }
 0x1b4   :  { %490 = vsyncpa [#allocation3], 1 }

</bundles_post_ra>
